<compile_context>
chip_gen: v7x
topology: tpu7x:2x2x1
jax: 0.10.0
libtpu: 0.0.40
codegen_flags: <defaults>
</compile_context>

<pallas_src>
import jax
import jax.numpy as jnp
from jax import lax
from jax.experimental import pallas as pl
from jax.experimental.pallas import tpu as pltpu

EPS = 1e-5


def _make_resblock_kernel(N, H, W, Cout):
    NH = N * H
    WC = W * Cout
    inv_count = 1.0 / float(N * H * W)

    def kernel(xcol_ref, w1sk_ref, t2col_ref, pool_ref, unpool_ref, bn_ref, o_ref):
        pool = pool_ref[...]          # (WC, Cout)  0/1 f32: fold lanes -> channels
        unpool = unpool_ref[...]      # (Cout, WC)  0/1 f32: expand channels -> lanes
        bn = bn_ref[...]              # (6, Cout)   f32: [g1, be1, g2, be2, gsc, besc]

        def bn_train(y, g_row, b_row):
            # Fused single pass: per-lane sum & sum-of-squares, then channel fold.
            s = jnp.sum(y, axis=0, keepdims=True)            # (1, WC)
            ss = jnp.sum(y * y, axis=0, keepdims=True)       # (1, WC)
            stats = jnp.concatenate([s, ss], axis=0)         # (2, WC)
            stats_c = jnp.dot(stats, pool,
                              preferred_element_type=jnp.float32)     # (2, Cout)
            mean = stats_c[0:1, :] * inv_count
            var = stats_c[1:2, :] * inv_count - mean * mean
            scale_c = g_row * lax.rsqrt(var + EPS)
            shift_c = b_row - mean * scale_c
            lane = jnp.dot(jnp.concatenate([scale_c, shift_c], axis=0), unpool,
                           preferred_element_type=jnp.float32)         # (2, WC)
            return y * lane[0:1, :] + lane[1:2, :]

        # ---- conv1 (3x3) + skip (1x1): ONE bf16 MXU matmul, f32 accumulation ----
        r = jnp.dot(xcol_ref[...], w1sk_ref[...],
                    preferred_element_type=jnp.float32)      # (NH, 2*WC) f32
        y1 = r[:, :WC]                                       # conv1 pre-BN
        ysk = r[:, WC:]                                      # skip  pre-BN

        a1 = jnp.maximum(bn_train(y1, bn[0:1, :], bn[1:2, :]), 0.0)    # BN1 + ReLU

        # ---- conv2 (3x3): in-kernel dy-im2col with masked halo rows, ONE matmul ----
        a1b = a1.astype(jnp.bfloat16)
        h = lax.broadcasted_iota(jnp.int32, (NH, 1), 0) % H
        zrow = jnp.zeros((1, WC), dtype=jnp.bfloat16)
        prev = jnp.concatenate([zrow, a1b[:NH - 1, :]], axis=0)   # row r sees a1[r-1]
        nxt = jnp.concatenate([a1b[1:, :], zrow], axis=0)         # row r sees a1[r+1]
        prev = jnp.where(h == 0, jnp.zeros_like(prev), prev)      # zero h==0 halo
        nxt = jnp.where(h == H - 1, jnp.zeros_like(nxt), nxt)     # zero h==H-1 halo
        x2 = jnp.concatenate([prev, a1b, nxt], axis=1)            # (NH, 3*WC) bf16
        y2 = jnp.dot(x2, t2col_ref[...],
                     preferred_element_type=jnp.float32)          # (NH, WC) f32

        y2 = bn_train(y2, bn[2:3, :], bn[3:4, :])                 # BN2
        sk = bn_train(ysk, bn[4:5, :], bn[5:6, :])                # skip BN
        o_ref[...] = sk + y2                                      # lane-dense store

    return kernel


def _row_toeplitz(w_taps, w_out, in_width, in_offset):
    """Row-conv (taps over dx) -> (in_width*Ci, w_out*Co) block-Toeplitz matrix.

    Input rows use lane layout wi*Ci + ci; outputs use wo*Co + co; tap dx
    contributes at wi = wo + dx + in_offset (indices outside [0, in_width)
    are dropped, which implements zero-padding along W).
    """
    kw, ci, co = w_taps.shape
    wi = jnp.arange(in_width)[:, None, None]
    wo = jnp.arange(w_out)[None, :, None]
    dx = jnp.arange(kw)[None, None, :]
    sel = (wi == wo + dx + in_offset).astype(w_taps.dtype)   # (in_width, w_out, kw)
    t = jnp.einsum("iwk,kco->icwo", sel, w_taps)             # (in_width, ci, w_out, co)
    return t.reshape(in_width * ci, w_out * co)


def resblock_pallas(x_nchw, p):
    N, Cin, H, W = x_nchw.shape
    Cout = p["w1"].shape[-1]
    Wp = W + 2
    NH, WC = N * H, W * Cout

    # ---- wrapper glue (not the hot path): layout, padding, im2col, weight prep ----
    x = jnp.transpose(x_nchw, (0, 2, 3, 1)).astype(jnp.float32)        # NHWC
    xpad = jnp.pad(x, ((0, 0), (1, 1), (1, 1), (0, 0)))                # (N, H+2, Wp, Cin)
    xflat = xpad.reshape(N, H + 2, Wp * Cin)
    xcol = jnp.concatenate(
        [xflat[:, dy:dy + H, :].reshape(NH, Wp * Cin) for dy in range(3)],
        axis=1).astype(jnp.bfloat16)                                   # (NH, 3*Wp*Cin)

    # conv1 Toeplitz (padded row rep: wi = wo + dx) stacked over dy, with the skip
    # 1x1 (wi = wo + 1, only the dy==1 block) appended as extra output columns.
    t1 = jnp.concatenate([_row_toeplitz(p["w1"][dy], W, Wp, 0) for dy in range(3)],
                         axis=0)                                       # (3*Wp*Cin, WC)
    tsk = _row_toeplitz(p["wsc"][None], W, Wp, 1)                      # (Wp*Cin, WC)
    zsk = jnp.zeros_like(tsk)
    w1sk = jnp.concatenate(
        [t1, jnp.concatenate([zsk, tsk, zsk], axis=0)], axis=1
    ).astype(jnp.bfloat16)                                             # (3*Wp*Cin, 2*WC)

    # conv2 Toeplitz (unpadded row rep: wi = wo + dx - 1) stacked over dy.
    t2col = jnp.concatenate([_row_toeplitz(p["w2"][dy], W, W, -1) for dy in range(3)],
                            axis=0).astype(jnp.bfloat16)               # (3*WC, WC)

    # 0/1 fold/expand matrices between the lane layout (w*Cout + c) and channels.
    lane_c = jnp.arange(WC) % Cout
    pool = (lane_c[:, None] == jnp.arange(Cout)[None, :]).astype(jnp.float32)  # (WC, Cout)
    unpool = pool.T                                                             # (Cout, WC)

    # gamma/beta table.  Conv biases b1/b2/bsc are intentionally not passed:
    # training-mode BN subtracts the batch mean, which cancels them exactly.
    bn = jnp.stack([p["g1"].reshape(-1), p["be1"].reshape(-1),
                    p["g2"].reshape(-1), p["be2"].reshape(-1),
                    p["gsc"].reshape(-1), p["besc"].reshape(-1)],
                   axis=0).astype(jnp.float32)                          # (6, Cout)

    flops = (2 * NH * (3 * Wp * Cin) * (2 * WC)      # conv1 + skip matmul
             + 2 * NH * (3 * WC) * WC                # conv2 matmul
             + 12 * NH * WC)                         # BN / ReLU elementwise
    bytes_accessed = (xcol.size * 2 + w1sk.size * 2 + t2col.size * 2
                      + (pool.size + unpool.size + bn.size) * 4 + NH * WC * 4)

    vmem = pl.BlockSpec(memory_space=pltpu.MemorySpace.VMEM)
    out2d = pl.pallas_call(
        _make_resblock_kernel(N, H, W, Cout),
        out_shape=jax.ShapeDtypeStruct((NH, WC), jnp.float32),
        in_specs=[vmem] * 6,
        out_specs=vmem,
        compiler_params=pltpu.CompilerParams(vmem_limit_bytes=32 * 1024 * 1024),
        cost_estimate=pl.CostEstimate(flops=flops, transcendentals=3 * Cout,
                                      bytes_accessed=bytes_accessed),
    )(xcol, w1sk, t2col, pool, unpool, bn)

    return jnp.transpose(out2d.reshape(N, H, W, Cout), (0, 3, 1, 2))    # back to NCHW


# -------------------- pure-JAX reference (for verification) --------------------
def _bn_ref(y, g, b):
    m = jnp.mean(y, axis=(0, 1, 2), keepdims=True)
    v = jnp.mean((y - m) ** 2, axis=(0, 1, 2), keepdims=True)
    return (y - m) * lax.rsqrt(v + EPS) * g.reshape(1, 1, 1, -1) + b.reshape(1, 1, 1, -1)


def resblock_ref(x_nchw, p):
    x = jnp.transpose(x_nchw, (0, 2, 3, 1)).astype(jnp.float32)

    def conv(a, w, b):
        return lax.conv_general_dilated(
            a, w, window_strides=(1, 1), padding="SAME",
            dimension_numbers=("NHWC", "HWIO", "NHWC")) + b.reshape(1, 1, 1, -1)

    out = jax.nn.relu(_bn_ref(conv(x, p["w1"], p["b1"]), p["g1"], p["be1"]))
    out = _bn_ref(conv(out, p["w2"], p["b2"]), p["g2"], p["be2"])
    sk = jnp.einsum("nhwc,co->nhwo", x, p["wsc"]) + p["bsc"].reshape(1, 1, 1, -1)
    sk = _bn_ref(sk, p["gsc"], p["besc"])
    return jnp.transpose(sk + out, (0, 3, 1, 2))


if __name__ == "__main__":
    N, Cin, Cout, H, W = 2, 4, 8, 16, 16

    key = jax.random.PRNGKey(0)
    ks = jax.random.split(key, 7)
    params = {
        "w1": jax.random.normal(ks[0], (3, 3, Cin, Cout), jnp.float32) * 0.1,
        "b1": jax.random.normal(ks[1], (1, Cout), jnp.float32) * 0.05,
        "g1": jnp.ones((1, Cout), jnp.float32),
        "be1": jnp.zeros((1, Cout), jnp.float32),
        "w2": jax.random.normal(ks[2], (3, 3, Cout, Cout), jnp.float32) * 0.1,
        "b2": jax.random.normal(ks[3], (1, Cout), jnp.float32) * 0.05,
        "g2": jnp.ones((1, Cout), jnp.float32),
        "be2": jnp.zeros((1, Cout), jnp.float32),
        "wsc": jax.random.normal(ks[4], (Cin, Cout), jnp.float32) * 0.1,
        "bsc": jax.random.normal(ks[5], (1, Cout), jnp.float32) * 0.05,
        "gsc": jnp.ones((1, Cout), jnp.float32),
        "besc": jnp.zeros((1, Cout), jnp.float32),
    }
    x = jax.random.normal(ks[6], (N, Cin, H, W), jnp.float32)

    out = jax.block_until_ready(jax.jit(resblock_pallas)(x, params))
    ref = jax.block_until_ready(resblock_ref(x, params))

    assert out.shape == (N, Cout, H, W), out.shape
    err = float(jnp.max(jnp.abs(out - ref)))
    # bf16 MXU inputs (with f32 accumulation and f32 BN math) loosen agreement
    # versus the pure-f32 reference; structure/semantics are identical.
    assert jnp.allclose(out, ref, rtol=3e-2, atol=3e-2), err
    print("KERNEL_OK")
</pallas_src>

<mosaic_0001>
module attributes {stable_mosaic.version = 11 : i64} {
  func.func @kernel(%arg0: memref<32x216xbf16, #tpu.memory_space<vmem>>, %arg1: memref<216x256xbf16, #tpu.memory_space<vmem>>, %arg2: memref<384x128xbf16, #tpu.memory_space<vmem>>, %arg3: memref<128x8xf32, #tpu.memory_space<vmem>>, %arg4: memref<8x128xf32, #tpu.memory_space<vmem>>, %arg5: memref<6x8xf32, #tpu.memory_space<vmem>>, %arg6: memref<32x128xf32, #tpu.memory_space<vmem>>) attributes {dimension_semantics = [], scalar_prefetch = 0 : i64, scratch_operands = 0 : i64, tpu.core_type = #tpu.core_type<tc>} {
    %c0 = arith.constant 0 : index
    %c0_0 = arith.constant 0 : index
    %0 = vector.load %arg3[%c0, %c0_0] : memref<128x8xf32, #tpu.memory_space<vmem>>, vector<128x8xf32>
    %c0_1 = arith.constant 0 : index
    %c0_2 = arith.constant 0 : index
    %1 = vector.load %arg4[%c0_1, %c0_2] : memref<8x128xf32, #tpu.memory_space<vmem>>, vector<8x128xf32>
    %c0_3 = arith.constant 0 : index
    %c0_4 = arith.constant 0 : index
    %2 = vector.load %arg5[%c0_3, %c0_4] : memref<6x8xf32, #tpu.memory_space<vmem>>, vector<6x8xf32>
    %c0_5 = arith.constant 0 : index
    %c0_6 = arith.constant 0 : index
    %3 = vector.load %arg0[%c0_5, %c0_6] : memref<32x216xbf16, #tpu.memory_space<vmem>>, vector<32x216xbf16>
    %c0_7 = arith.constant 0 : index
    %c0_8 = arith.constant 0 : index
    %4 = vector.load %arg1[%c0_7, %c0_8] : memref<216x256xbf16, #tpu.memory_space<vmem>>, vector<216x256xbf16>
    %cst = arith.constant dense<0.000000e+00> : vector<32x256xf32>
    %5 = tpu.matmul %3, %4, %cst {dimension_numbers = #tpu.dot_dimension_numbers<[1], [0], [0], [1], [0, 0, 1, 1], [], []>} : vector<32x216xbf16>, vector<216x256xbf16>, vector<32x256xf32> -> vector<32x256xf32>
    %6 = vector.extract_strided_slice %5 {offsets = [0, 0], sizes = [32, 128], strides = [1, 1]} : vector<32x256xf32> to vector<32x128xf32>
    %7 = vector.extract_strided_slice %5 {offsets = [0, 128], sizes = [32, 128], strides = [1, 1]} : vector<32x256xf32> to vector<32x128xf32>
    %8 = vector.extract_strided_slice %2 {offsets = [0, 0], sizes = [1, 8], strides = [1, 1]} : vector<6x8xf32> to vector<1x8xf32>
    %9 = vector.extract_strided_slice %2 {offsets = [1, 0], sizes = [1, 8], strides = [1, 1]} : vector<6x8xf32> to vector<1x8xf32>
    %cst_9 = arith.constant dense<0.000000e+00> : vector<128xf32>
    %10 = vector.multi_reduction <add>, %6, %cst_9 [0] : vector<32x128xf32> to vector<128xf32>
    %11 = vector.shape_cast %10 : vector<128xf32> to vector<1x128xf32>
    %12 = arith.mulf %6, %6 : vector<32x128xf32>
    %cst_10 = arith.constant dense<0.000000e+00> : vector<128xf32>
    %13 = vector.multi_reduction <add>, %12, %cst_10 [0] : vector<32x128xf32> to vector<128xf32>
    %14 = vector.shape_cast %13 : vector<128xf32> to vector<1x128xf32>
    %15 = tpu.concatenate %11, %14 in 0 : vector<1x128xf32>, vector<1x128xf32> -> vector<2x128xf32>
    %cst_11 = arith.constant dense<0.000000e+00> : vector<2x8xf32>
    %16 = tpu.matmul %15, %0, %cst_11 {dimension_numbers = #tpu.dot_dimension_numbers<[1], [0], [0], [1], [0, 0, 1, 1], [], []>} : vector<2x128xf32>, vector<128x8xf32>, vector<2x8xf32> -> vector<2x8xf32>
    %17 = vector.extract_strided_slice %16 {offsets = [0, 0], sizes = [1, 8], strides = [1, 1]} : vector<2x8xf32> to vector<1x8xf32>
    %cst_12 = arith.constant 0.001953125 : f32
    %18 = vector.broadcast %cst_12 : f32 to vector<1x8xf32>
    %19 = arith.mulf %17, %18 : vector<1x8xf32>
    %20 = vector.extract_strided_slice %16 {offsets = [1, 0], sizes = [1, 8], strides = [1, 1]} : vector<2x8xf32> to vector<1x8xf32>
    %cst_13 = arith.constant 0.001953125 : f32
    %21 = vector.broadcast %cst_13 : f32 to vector<1x8xf32>
    %22 = arith.mulf %20, %21 : vector<1x8xf32>
    %23 = arith.mulf %19, %19 : vector<1x8xf32>
    %24 = arith.subf %22, %23 : vector<1x8xf32>
    %cst_14 = arith.constant 9.99999974E-6 : f32
    %25 = vector.broadcast %cst_14 : f32 to vector<1x8xf32>
    %26 = arith.addf %24, %25 : vector<1x8xf32>
    %27 = math.rsqrt %26 : vector<1x8xf32>
    %28 = arith.mulf %8, %27 : vector<1x8xf32>
    %29 = arith.mulf %19, %28 : vector<1x8xf32>
    %30 = arith.subf %9, %29 : vector<1x8xf32>
    %31 = tpu.concatenate %28, %30 in 0 : vector<1x8xf32>, vector<1x8xf32> -> vector<2x8xf32>
    %cst_15 = arith.constant dense<0.000000e+00> : vector<2x128xf32>
    %32 = tpu.matmul %31, %1, %cst_15 {dimension_numbers = #tpu.dot_dimension_numbers<[1], [0], [0], [1], [0, 0, 1, 1], [], []>} : vector<2x8xf32>, vector<8x128xf32>, vector<2x128xf32> -> vector<2x128xf32>
    %33 = vector.extract_strided_slice %32 {offsets = [0, 0], sizes = [1, 128], strides = [1, 1]} : vector<2x128xf32> to vector<1x128xf32>
    %34 = vector.broadcast %33 : vector<1x128xf32> to vector<32x128xf32>
    %35 = arith.mulf %6, %34 : vector<32x128xf32>
    %36 = vector.extract_strided_slice %32 {offsets = [1, 0], sizes = [1, 128], strides = [1, 1]} : vector<2x128xf32> to vector<1x128xf32>
    %37 = vector.broadcast %36 : vector<1x128xf32> to vector<32x128xf32>
    %38 = arith.addf %35, %37 : vector<32x128xf32>
    %cst_16 = arith.constant 0.000000e+00 : f32
    %39 = vector.broadcast %cst_16 : f32 to vector<32x128xf32>
    %40 = arith.maximumf %38, %39 : vector<32x128xf32>
    %41 = arith.truncf %40 : vector<32x128xf32> to vector<32x128xbf16>
    %42 = tpu.iota {dimensions = array<i32: 0>} : vector<32x1xi32>
    %c16_i32 = arith.constant 16 : i32
    %c0_i32 = arith.constant 0 : i32
    %43 = arith.cmpi eq, %c16_i32, %c0_i32 : i32
    %c1_i32 = arith.constant 1 : i32
    %44 = arith.select %43, %c1_i32, %c16_i32 : i32
    %45 = vector.broadcast %44 : i32 to vector<32x1xi32>
    %46 = arith.remsi %42, %45 : vector<32x1xi32>
    %c0_i32_17 = arith.constant 0 : i32
    %47 = vector.broadcast %c0_i32_17 : i32 to vector<32x1xi32>
    %48 = arith.cmpi ne, %46, %47 : vector<32x1xi32>
    %c0_i32_18 = arith.constant 0 : i32
    %49 = vector.broadcast %c0_i32_18 : i32 to vector<32x1xi32>
    %50 = arith.cmpi slt, %46, %49 : vector<32x1xi32>
    %c0_i32_19 = arith.constant 0 : i32
    %51 = arith.cmpi slt, %44, %c0_i32_19 : i32
    %52 = vector.broadcast %51 : i1 to vector<32x1xi1>
    %53 = vector.broadcast %52 : vector<32x1xi1> to vector<32x1xi1>
    %54 = arith.xori %50, %53 : vector<32x1xi1>
    %55 = arith.andi %54, %48 : vector<32x1xi1>
    %56 = vector.broadcast %44 : i32 to vector<32x1xi32>
    %57 = arith.addi %46, %56 : vector<32x1xi32>
    %58 = arith.select %55, %57, %46 : vector<32x1xi1>, vector<32x1xi32>
    %cst_20 = arith.constant 0.000000e+00 : bf16
    %59 = vector.broadcast %cst_20 : bf16 to vector<1x128xbf16>
    %60 = vector.extract_strided_slice %41 {offsets = [0, 0], sizes = [31, 128], strides = [1, 1]} : vector<32x128xbf16> to vector<31x128xbf16>
    %61 = tpu.concatenate %59, %60 in 0 : vector<1x128xbf16>, vector<31x128xbf16> -> vector<32x128xbf16>
    %62 = vector.extract_strided_slice %41 {offsets = [1, 0], sizes = [31, 128], strides = [1, 1]} : vector<32x128xbf16> to vector<31x128xbf16>
    %63 = tpu.concatenate %62, %59 in 0 : vector<31x128xbf16>, vector<1x128xbf16> -> vector<32x128xbf16>
    %c0_i32_21 = arith.constant 0 : i32
    %64 = vector.broadcast %c0_i32_21 : i32 to vector<32x1xi32>
    %65 = arith.cmpi eq, %58, %64 : vector<32x1xi32>
    %cst_22 = arith.constant 0.000000e+00 : bf16
    %66 = vector.broadcast %cst_22 : bf16 to vector<32x128xbf16>
    %67 = vector.shape_cast %65 : vector<32x1xi1> to vector<32x1xi1>
    %68 = vector.broadcast %67 : vector<32x1xi1> to vector<32x128xi1>
    %69 = arith.select %68, %66, %61 : vector<32x128xi1>, vector<32x128xbf16>
    %c15_i32 = arith.constant 15 : i32
    %70 = vector.broadcast %c15_i32 : i32 to vector<32x1xi32>
    %71 = arith.cmpi eq, %58, %70 : vector<32x1xi32>
    %cst_23 = arith.constant 0.000000e+00 : bf16
    %72 = vector.broadcast %cst_23 : bf16 to vector<32x128xbf16>
    %73 = vector.shape_cast %71 : vector<32x1xi1> to vector<32x1xi1>
    %74 = vector.broadcast %73 : vector<32x1xi1> to vector<32x128xi1>
    %75 = arith.select %74, %72, %63 : vector<32x128xi1>, vector<32x128xbf16>
    %76 = tpu.concatenate %69, %41, %75 in 1 : vector<32x128xbf16>, vector<32x128xbf16>, vector<32x128xbf16> -> vector<32x384xbf16>
    %c0_24 = arith.constant 0 : index
    %c0_25 = arith.constant 0 : index
    %77 = vector.load %arg2[%c0_24, %c0_25] : memref<384x128xbf16, #tpu.memory_space<vmem>>, vector<384x128xbf16>
    %cst_26 = arith.constant dense<0.000000e+00> : vector<32x128xf32>
    %78 = tpu.matmul %76, %77, %cst_26 {dimension_numbers = #tpu.dot_dimension_numbers<[1], [0], [0], [1], [0, 0, 1, 1], [], []>} : vector<32x384xbf16>, vector<384x128xbf16>, vector<32x128xf32> -> vector<32x128xf32>
    %79 = vector.extract_strided_slice %2 {offsets = [2, 0], sizes = [1, 8], strides = [1, 1]} : vector<6x8xf32> to vector<1x8xf32>
    %80 = vector.extract_strided_slice %2 {offsets = [3, 0], sizes = [1, 8], strides = [1, 1]} : vector<6x8xf32> to vector<1x8xf32>
    %cst_27 = arith.constant dense<0.000000e+00> : vector<128xf32>
    %81 = vector.multi_reduction <add>, %78, %cst_27 [0] : vector<32x128xf32> to vector<128xf32>
    %82 = vector.shape_cast %81 : vector<128xf32> to vector<1x128xf32>
    %83 = arith.mulf %78, %78 : vector<32x128xf32>
    %cst_28 = arith.constant dense<0.000000e+00> : vector<128xf32>
    %84 = vector.multi_reduction <add>, %83, %cst_28 [0] : vector<32x128xf32> to vector<128xf32>
    %85 = vector.shape_cast %84 : vector<128xf32> to vector<1x128xf32>
    %86 = tpu.concatenate %82, %85 in 0 : vector<1x128xf32>, vector<1x128xf32> -> vector<2x128xf32>
    %cst_29 = arith.constant dense<0.000000e+00> : vector<2x8xf32>
    %87 = tpu.matmul %86, %0, %cst_29 {dimension_numbers = #tpu.dot_dimension_numbers<[1], [0], [0], [1], [0, 0, 1, 1], [], []>} : vector<2x128xf32>, vector<128x8xf32>, vector<2x8xf32> -> vector<2x8xf32>
    %88 = vector.extract_strided_slice %87 {offsets = [0, 0], sizes = [1, 8], strides = [1, 1]} : vector<2x8xf32> to vector<1x8xf32>
    %cst_30 = arith.constant 0.001953125 : f32
    %89 = vector.broadcast %cst_30 : f32 to vector<1x8xf32>
    %90 = arith.mulf %88, %89 : vector<1x8xf32>
    %91 = vector.extract_strided_slice %87 {offsets = [1, 0], sizes = [1, 8], strides = [1, 1]} : vector<2x8xf32> to vector<1x8xf32>
    %cst_31 = arith.constant 0.001953125 : f32
    %92 = vector.broadcast %cst_31 : f32 to vector<1x8xf32>
    %93 = arith.mulf %91, %92 : vector<1x8xf32>
    %94 = arith.mulf %90, %90 : vector<1x8xf32>
    %95 = arith.subf %93, %94 : vector<1x8xf32>
    %cst_32 = arith.constant 9.99999974E-6 : f32
    %96 = vector.broadcast %cst_32 : f32 to vector<1x8xf32>
    %97 = arith.addf %95, %96 : vector<1x8xf32>
    %98 = math.rsqrt %97 : vector<1x8xf32>
    %99 = arith.mulf %79, %98 : vector<1x8xf32>
    %100 = arith.mulf %90, %99 : vector<1x8xf32>
    %101 = arith.subf %80, %100 : vector<1x8xf32>
    %102 = tpu.concatenate %99, %101 in 0 : vector<1x8xf32>, vector<1x8xf32> -> vector<2x8xf32>
    %cst_33 = arith.constant dense<0.000000e+00> : vector<2x128xf32>
    %103 = tpu.matmul %102, %1, %cst_33 {dimension_numbers = #tpu.dot_dimension_numbers<[1], [0], [0], [1], [0, 0, 1, 1], [], []>} : vector<2x8xf32>, vector<8x128xf32>, vector<2x128xf32> -> vector<2x128xf32>
    %104 = vector.extract_strided_slice %103 {offsets = [0, 0], sizes = [1, 128], strides = [1, 1]} : vector<2x128xf32> to vector<1x128xf32>
    %105 = vector.broadcast %104 : vector<1x128xf32> to vector<32x128xf32>
    %106 = arith.mulf %78, %105 : vector<32x128xf32>
    %107 = vector.extract_strided_slice %103 {offsets = [1, 0], sizes = [1, 128], strides = [1, 1]} : vector<2x128xf32> to vector<1x128xf32>
    %108 = vector.broadcast %107 : vector<1x128xf32> to vector<32x128xf32>
    %109 = arith.addf %106, %108 : vector<32x128xf32>
    %110 = vector.extract_strided_slice %2 {offsets = [4, 0], sizes = [1, 8], strides = [1, 1]} : vector<6x8xf32> to vector<1x8xf32>
    %111 = vector.extract_strided_slice %2 {offsets = [5, 0], sizes = [1, 8], strides = [1, 1]} : vector<6x8xf32> to vector<1x8xf32>
    %cst_34 = arith.constant dense<0.000000e+00> : vector<128xf32>
    %112 = vector.multi_reduction <add>, %7, %cst_34 [0] : vector<32x128xf32> to vector<128xf32>
    %113 = vector.shape_cast %112 : vector<128xf32> to vector<1x128xf32>
    %114 = arith.mulf %7, %7 : vector<32x128xf32>
    %cst_35 = arith.constant dense<0.000000e+00> : vector<128xf32>
    %115 = vector.multi_reduction <add>, %114, %cst_35 [0] : vector<32x128xf32> to vector<128xf32>
    %116 = vector.shape_cast %115 : vector<128xf32> to vector<1x128xf32>
    %117 = tpu.concatenate %113, %116 in 0 : vector<1x128xf32>, vector<1x128xf32> -> vector<2x128xf32>
    %cst_36 = arith.constant dense<0.000000e+00> : vector<2x8xf32>
    %118 = tpu.matmul %117, %0, %cst_36 {dimension_numbers = #tpu.dot_dimension_numbers<[1], [0], [0], [1], [0, 0, 1, 1], [], []>} : vector<2x128xf32>, vector<128x8xf32>, vector<2x8xf32> -> vector<2x8xf32>
    %119 = vector.extract_strided_slice %118 {offsets = [0, 0], sizes = [1, 8], strides = [1, 1]} : vector<2x8xf32> to vector<1x8xf32>
    %cst_37 = arith.constant 0.001953125 : f32
    %120 = vector.broadcast %cst_37 : f32 to vector<1x8xf32>
    %121 = arith.mulf %119, %120 : vector<1x8xf32>
    %122 = vector.extract_strided_slice %118 {offsets = [1, 0], sizes = [1, 8], strides = [1, 1]} : vector<2x8xf32> to vector<1x8xf32>
    %cst_38 = arith.constant 0.001953125 : f32
    %123 = vector.broadcast %cst_38 : f32 to vector<1x8xf32>
    %124 = arith.mulf %122, %123 : vector<1x8xf32>
    %125 = arith.mulf %121, %121 : vector<1x8xf32>
    %126 = arith.subf %124, %125 : vector<1x8xf32>
    %cst_39 = arith.constant 9.99999974E-6 : f32
    %127 = vector.broadcast %cst_39 : f32 to vector<1x8xf32>
    %128 = arith.addf %126, %127 : vector<1x8xf32>
    %129 = math.rsqrt %128 : vector<1x8xf32>
    %130 = arith.mulf %110, %129 : vector<1x8xf32>
    %131 = arith.mulf %121, %130 : vector<1x8xf32>
    %132 = arith.subf %111, %131 : vector<1x8xf32>
    %133 = tpu.concatenate %130, %132 in 0 : vector<1x8xf32>, vector<1x8xf32> -> vector<2x8xf32>
    %cst_40 = arith.constant dense<0.000000e+00> : vector<2x128xf32>
    %134 = tpu.matmul %133, %1, %cst_40 {dimension_numbers = #tpu.dot_dimension_numbers<[1], [0], [0], [1], [0, 0, 1, 1], [], []>} : vector<2x8xf32>, vector<8x128xf32>, vector<2x128xf32> -> vector<2x128xf32>
    %135 = vector.extract_strided_slice %134 {offsets = [0, 0], sizes = [1, 128], strides = [1, 1]} : vector<2x128xf32> to vector<1x128xf32>
    %136 = vector.broadcast %135 : vector<1x128xf32> to vector<32x128xf32>
    %137 = arith.mulf %7, %136 : vector<32x128xf32>
    %138 = vector.extract_strided_slice %134 {offsets = [1, 0], sizes = [1, 128], strides = [1, 1]} : vector<2x128xf32> to vector<1x128xf32>
    %139 = vector.broadcast %138 : vector<1x128xf32> to vector<32x128xf32>
    %140 = arith.addf %137, %139 : vector<32x128xf32>
    %141 = arith.addf %140, %109 : vector<32x128xf32>
    %c0_41 = arith.constant 0 : index
    %c0_42 = arith.constant 0 : index
    %142 = vector.load %arg6[%c0_41, %c0_42] : memref<32x128xf32, #tpu.memory_space<vmem>>, vector<32x128xf32>
    tpu.vector_store %arg6[%c0_41, %c0_42], %141 {strides = array<i32>} : memref<32x128xf32, #tpu.memory_space<vmem>>, vector<32x128xf32>,
    return
  }
}

</mosaic_0001>

<bundles_post_ra>
// kernel: resblock_pallas.1
= control target key start
LH: loop header
LB: loop body
LE: loop exit
PB: predicated region body
PF: predicated region fallthrough
CT: control target
= control target key end

     0   :  { %v1828_v1 = vmov 0.0|0.0   ;;  %vm228_vm0 = vcmask 719872   ;;  %vm235_vm1 = vcmask 1043456   ;;  %vm1829_vm2 = vmmov 0   ;;  %s2334_s1 = inlined_call_operand.vmem [shape: bf16[216,256], index: 1, kind: input, shape index: {}]   ;;  %s2335_s0 = inlined_call_operand.vmem [shape: bf16[32,216], index: 0, kind: input, shape index: {}]   ;;  %s2336_s3 = inlined_call_operand.vmem [shape: f32[128,8], index: 3, kind: input, shape index: {}]   ;;  %s2337_s4 = inlined_call_operand.vmem [shape: f32[8,128], index: 4, kind: input, shape index: {}]   ;;  %s2338_s2 = inlined_call_operand.vmem [shape: bf16[384,128], index: 2, kind: input, shape index: {}]   ;;  %s2339_s5 = inlined_call_operand.vmem [shape: f32[6,8], index: 5, kind: input, shape index: {}]   ;;  %s2340_s6 = inlined_call_operand.vmem [shape: f32[32,128], index: 6, kind: output, shape index: {}]  }
   0x1   :  { %v1751_v0 = vld [vmem:[%s2334_s1 + $0x4] ss:$8 sps:$4 sm:$0xff]   ;;  %1675 = vmatprep.subr.bf16.mxu1 %v1828_v1  ;;  %v1753_v2 = vld [vmem:[%s2334_s1] ss:$8 sps:$4 sm:$0xff]   ;;  %v1754_v3 = vld [vmem:[%s2334_s1 + $0x14] ss:$8 sps:$4 sm:$0xff]  }
   0x2   :  { %242 = vmatprep.subr.bf16.mxu0 %v1751_v0  ;;  %v1756_v4 = vld [vmem:[%s2334_s1 + $0x10] ss:$8 sps:$4 sm:$0xff]   ;;  %v1757_v5 = vld [vmem:[%s2334_s1 + $0x24] ss:$8 sps:$4 sm:$0xff]   ;;  %v1759_v6 = vld [vmem:[%s2334_s1 + $0x20] ss:$8 sps:$4 sm:$0xff]  }
   0x3   :  { %243 = vmatpush1.bf16.msra.mxu0 %v1753_v2  ;;  %v1760_v7 = vld [vmem:[%s2334_s1 + $0x34] ss:$8 sps:$4 sm:$0xff]   ;;  %v1762_v8 = vld [vmem:[%s2334_s1 + $0x30] ss:$8 sps:$4 sm:$0xff]   ;;  %v1763_v9 = vld [vmem:[%s2334_s1 + $0x44] ss:$8 sps:$4 sm:$0xff]  }
   0x4   :  { %244 = vmatprep.subr.bf16.mxu0 %v1754_v3  ;;  %v1765_v10 = vld [vmem:[%s2334_s1 + $0x40] ss:$8 sps:$4 sm:$0xff]   ;;  %v1766_v11 = vld [vmem:[%s2334_s1 + $0x54] ss:$8 sps:$4 sm:$0xff]   ;;  %v1794_v12 = vld [vmem:[%s2335_s0 + $0x4] ss:$8 sps:$4 sm:$0xff]  }
   0x5   :  { %v1768_v13 = vld [vmem:[%s2334_s1 + $0x50] ss:$8 sps:$4 sm:$0xff]   ;;  %v1769_v14 = vld [vmem:[%s2334_s1 + $0x64] ss:$8 sps:$4 sm:$0xff]   ;;  %1395 = vmatprep.mubr.msk.bf16.mxu0 %vm228_vm0, %v1794_v12  ;;  %v1771_v18 = vld [vmem:[%s2334_s1 + $0x60] ss:$8 sps:$4 sm:$0xff]  }
   0x6   :  { %v26_v15 = vld [vmem:[%s2336_s3] sm:$0xff]  ;;  %v27_v16 = vld [vmem:[%s2336_s3 + $0x8] sm:$0xff]  ;;  %v1772_v19 = vld [vmem:[%s2334_s1 + $0x74] ss:$8 sps:$4 sm:$0xff]   ;;  %v1830_v59 = vmov 0.0   ;;  %vm317_vm3 = vcmask 1040384  }
   0x7   :  { %245 = vmatpush1.bf16.msra.mxu0 %v1756_v4  ;;  %v1917_v17 = vpack.c.bf16 %v27_v16, %v26_v15  ;;  %v1774_v20 = vld [vmem:[%s2334_s1 + $0x70] ss:$8 sps:$4 sm:$0xff]   ;;  %v1775_v21 = vld [vmem:[%s2334_s1 + $0x84] ss:$8 sps:$4 sm:$0xff]   ;;  %v1777_v22 = vld [vmem:[%s2334_s1 + $0x80] ss:$8 sps:$4 sm:$0xff]   ;;  %1567 = vmatprep.mubr.msk.f32.mxu1 %vm1829_vm2, %v1830_v59 }
   0x8   :  { %246 = vmatprep.subr.bf16.mxu0 %v1757_v5  ;;  %v1778_v23 = vld [vmem:[%s2334_s1 + $0x94] ss:$8 sps:$4 sm:$0xff]   ;;  %v1780_v24 = vld [vmem:[%s2334_s1 + $0x90] ss:$8 sps:$4 sm:$0xff]   ;;  %v1781_v25 = vld [vmem:[%s2334_s1 + $0xa4] ss:$8 sps:$4 sm:$0xff]  }
   0x9   :  { %1677 = vmatpush3.bf16.msra.mxu1 %v1917_v17  ;;  %v1783_v26 = vld [vmem:[%s2334_s1 + $0xa0] ss:$8 sps:$4 sm:$0xff]   ;;  %v1784_v27 = vld [vmem:[%s2334_s1 + $0xb4] ss:$8 sps:$4 sm:$0xff]   ;;  %v1786_v28 = vld [vmem:[%s2334_s1 + $0xb0] ss:$8 sps:$4 sm:$0xff]  }
   0xa   :  { %1678 = vmatprep.subr.bf16.mxu1 %v1828_v1  ;;  %v1787_v29 = vld [vmem:[%s2334_s1 + $0xc4] ss:$8 sps:$4 sm:$0xff]   ;;  %v74_v30 = vld [vmem:[%s2334_s1 + $0xd0] sm:$0xff]  ;;  %v1789_v31 = vld [vmem:[%s2334_s1 + $0xc0] ss:$8 sps:$4 sm:$0xff]   ;;  %vm407_vm4 = vcmask 64512  }
   0xb   :  { %247 = vmatpush1.bf16.msra.mxu0 %v1759_v6  ;;  %v1393_v32 = vcombine.high %v74_v30, %v74_v30  ;;  %v1392_v33 = vcombine.low %v74_v30, %v74_v30  ;;  %v1792_v35 = vld [vmem:[%s2335_s0] ss:$8 sps:$4 sm:$0xff]   ;;  %v1795_v36 = vld [vmem:[%s2335_s0 + $0x14] ss:$8 sps:$4 sm:$0xff]   ;;  %v1797_v37 = vld [vmem:[%s2335_s0 + $0x10] ss:$8 sps:$4 sm:$0xff]  }
   0xc   :  { %248 = vmatprep.subr.bf16.mxu0 %v1760_v7  ;;  %v28_v38 = vld [vmem:[%s2336_s3 + $0x10] sm:$0xff]  ;;  %v29_v39 = vld [vmem:[%s2336_s3 + $0x18] sm:$0xff]  ;;  %v30_v41 = vld [vmem:[%s2336_s3 + $0x20] sm:$0xff]  ;;  %vm556_vm12 = vsmask.f32 256  ;;  %vm585_vm14 = vcmask 1047552  }
   0xd   :  { %v237_v34 = vsel %vm235_vm1, %v1392_v33, 0  ;;  %v1979_v40 = vpack.c.bf16 %v29_v39, %v28_v38  ;;  %v31_v42 = vld [vmem:[%s2336_s3 + $0x28] sm:$0xff]  ;;  %v32_v44 = vld [vmem:[%s2336_s3 + $0x30] sm:$0xff]  ;;  %v33_v45 = vld [vmem:[%s2336_s3 + $0x38] sm:$0xff]  ;;  %vm577_vm13 = vsmask.f32 7424 }
   0xe   :  { %v1989_v43 = vpack.c.bf16 %v31_v42, %v30_v41  ;;  %v1999_v46 = vpack.c.bf16 %v33_v45, %v32_v44  ;;  %v34_v47 = vld [vmem:[%s2336_s3 + $0x40] sm:$0xff]  ;;  %v35_v48 = vld [vmem:[%s2336_s3 + $0x48] sm:$0xff]  ;;  %v36_v50 = vld [vmem:[%s2336_s3 + $0x50] sm:$0xff] }
   0xf   :  { %249 = vmatpush1.bf16.msra.mxu0 %v1762_v8  ;;  %1680 = vmatpush3.bf16.msra.mxu1 %v1979_v40  ;;  %v2009_v49 = vpack.c.bf16 %v35_v48, %v34_v47  ;;  %v37_v51 = vld [vmem:[%s2336_s3 + $0x58] sm:$0xff]  ;;  %v38_v53 = vld [vmem:[%s2336_s3 + $0x60] sm:$0xff]  ;;  %v39_v54 = vld [vmem:[%s2336_s3 + $0x68] sm:$0xff] }
  0x10   :  { %250 = vmatprep.subr.bf16.mxu0 %v1763_v9  ;;  %1681 = vmatprep.subr.bf16.mxu1 %v1828_v1  ;;  %v2019_v52 = vpack.c.bf16 %v37_v51, %v36_v50  ;;  %v2029_v55 = vpack.c.bf16 %v39_v54, %v38_v53  ;;  %v40_v56 = vld [vmem:[%s2336_s3 + $0x70] sm:$0xff]  ;;  %v41_v57 = vld [vmem:[%s2336_s3 + $0x78] sm:$0xff]  ;;  %vm601_vm8 = vmpackc.low %vm1829_vm2, %vm1829_vm2 }
  0x11   :  { %v2039_v58 = vpack.c.bf16 %v41_v57, %v40_v56 }
  0x13   :  { %251 = vmatpush1.bf16.msra.mxu0 %v1765_v10  ;;  %1683 = vmatpush3.bf16.msra.mxu1 %v1989_v43 }
  0x14   :  { %252 = vmatprep.subr.bf16.mxu0 %v1766_v11  ;;  %1684 = vmatprep.subr.bf16.mxu1 %v1828_v1 }
  0x17   :  { %253 = vmatpush1.bf16.msra.mxu0 %v1768_v13  ;;  %1686 = vmatpush3.bf16.msra.mxu1 %v1999_v46 }
  0x18   :  { %254 = vmatprep.subr.bf16.mxu0 %v1769_v14  ;;  %1687 = vmatprep.subr.bf16.mxu1 %v1828_v1 }
  0x1b   :  { %255 = vmatpush1.bf16.msra.mxu0 %v1771_v18  ;;  %1689 = vmatpush3.bf16.msra.mxu1 %v2009_v49 }
  0x1c   :  { %256 = vmatprep.subr.bf16.mxu0 %v1772_v19  ;;  %1690 = vmatprep.subr.bf16.mxu1 %v1828_v1 }
  0x1f   :  { %257 = vmatpush1.bf16.msra.mxu0 %v1774_v20  ;;  %1692 = vmatpush3.bf16.msra.mxu1 %v2019_v52 }
  0x20   :  { %258 = vmatprep.subr.bf16.mxu0 %v1775_v21  ;;  %1693 = vmatprep.subr.bf16.mxu1 %v1828_v1 }
  0x23   :  { %259 = vmatpush1.bf16.msra.mxu0 %v1777_v22  ;;  %1695 = vmatpush3.bf16.msra.mxu1 %v2029_v55 }
  0x24   :  { %260 = vmatprep.subr.bf16.mxu0 %v1778_v23  ;;  %1696 = vmatprep.subr.bf16.mxu1 %v1828_v1 }
  0x27   :  { %261 = vmatpush1.bf16.msra.mxu0 %v1780_v24  ;;  %1698 = vmatpush3.bf16.msra.mxu1 %v2039_v58 }
  0x28   :  { %262 = vmatprep.subr.bf16.mxu0 %v1781_v25  ;;  %1570 = vmatprep.subr.mxu1 %v1830_v59 }
  0x2b   :  { %263 = vmatpush1.bf16.msra.mxu0 %v1783_v26 }
  0x2c   :  { %264 = vmatprep.subr.bf16.mxu0 %v1784_v27 }
  0x2f   :  { %265 = vmatpush1.bf16.msra.mxu0 %v1786_v28 }
  0x30   :  { %266 = vmatprep.subr.bf16.mxu0 %v1787_v29 }
  0x33   :  { %267 = vmatpush1.bf16.msra.mxu0 %v1789_v31 }
  0x34   :  { %1394 = vmatprep.subr.msk.bf16.mxu0 %vm235_vm1, %v1393_v32 }
  0x37   :  { %269 = vmatpush1.bf16.msra.mxu0 %v237_v34 }
  0x3a   :  { %275 = vmatmul.mubr.bf16.vlgmr.msra.gmra.mrb[0].mxu0 %v1792_v35 }
  0x3b   :  { %1396 = vmatprep.mubr.msk.bf16.mxu0 %vm228_vm0, %v1795_v36  ;;  %vm2219_vm0 = vmand %vm317_vm3, %vm556_vm12 }
  0x42   :  { %285 = vmatmul.mubr.bf16.gmra.mrb[4].mxu0 %v1797_v37 }
 0x10d   :  { %v2045_v60 = vpop.f32.mrb[0].mxu0 }
 0x10e   :  { %v2047_v61 = vpop.f32.mrb[1].mxu0  ;;  %v304_v63 = vmul.f32 %v2045_v60, %v2045_v60 }
 0x10f   :  { %v2049_v62 = vpop.f32.mrb[2].mxu0  ;;  %v1153_v4 = vmul.f32 %v2047_v61, %v2047_v61 }
 0x110   :  { %v295_v0 = vadd.f32 %v2049_v62, %v2045_v60  ;;  %v305_v2 = vmul.f32 %v2049_v62, %v2049_v62  ;;  %v2057_v3 = vpop.f32.mrb[3].mxu0 }
 0x111   :  { %v1144_v5 = vadd.f32 %v2057_v3, %v2047_v61  ;;  %v1154_v6 = vmul.f32 %v2057_v3, %v2057_v3 }
 0x112   :  { %v308_v7 = vadd.f32 %v305_v2, %v304_v63  ;;  %v2094_v63 = vld [vmem:[%s2337_s4] sm:$0xff] }
 0x113   :  { %v1157_v8 = vadd.f32 %v1154_v6, %v1153_v4  ;;  %v1799_v2 = vld [vmem:[%s2338_s2 + $0x80] sm:$0xff]   ;;  %v1802_v4 = vld [vmem:[%s2338_s2 + $0x88] sm:$0xff]   ;;  %v1808_v6 = vld [vmem:[%s2338_s2 + $0x98] sm:$0xff]  }
 0x114   :  { %1575 = vmatprep.subr.bf16.mxu0 %v1799_v2 }
 0x115   :  { %v2065_v9 = vpop.f32.mrb[4].mxu0  ;;  %1576 = vmatpush3.bf16.msra.mxu0 %v1799_v2 }
 0x116   :  { %v296_v10 = vadd.f32 %v295_v0, %v2065_v9  ;;  %v306_v11 = vmul.f32 %v2065_v9, %v2065_v9  ;;  %v2070_v12 = vpop.f32.mrb[5].mxu0  ;;  %v1798_v0 = vld [vmem:[%s2338_s2 + $0x40] sm:$0xff]   ;;  %1577 = vmatprep.subr.bf16.mxu0 %v1802_v4 }
 0x117   :  { %v1145_v13 = vadd.f32 %v1144_v5, %v2070_v12  ;;  %v1155_v14 = vmul.f32 %v2070_v12, %v2070_v12  ;;  %v2075_v15 = vpop.f32.mrb[6].mxu0  ;;  %v1805_v5 = vld [vmem:[%s2338_s2 + $0x90] sm:$0xff]  }
 0x118   :  { %v309_v16 = vadd.f32 %v308_v7, %v306_v11  ;;  %v297_v18 = vadd.f32 %v296_v10, %v2075_v15  ;;  %v307_v19 = vmul.f32 %v2075_v15, %v2075_v15  ;;  %v2080_v20 = vpop.f32.mrb[7].mxu0 }
 0x119   :  { %v1158_v21 = vadd.f32 %v1157_v8, %v1155_v14  ;;  %v1146_v22 = vadd.f32 %v1145_v13, %v2080_v20  ;;  %v1156_v23 = vmul.f32 %v2080_v20, %v2080_v20  ;;  %1578 = vmatpush3.bf16.msra.mxu0 %v1802_v4 }
 0x11a   :  { %v298_v24 = vrot.slane %v297_v18, 4  ;;  %v310_v25 = vadd.f32 %v309_v16, %v307_v19  ;;  %1579 = vmatprep.subr.bf16.mxu0 %v1805_v5  ;;  %v2115_v19 = vld [vmem:[%s2339_s5] sm:$0x3f] }
 0x11b   :  { %v1147_v26 = vrot.slane %v1146_v22, 4  ;;  %v1159_v27 = vadd.f32 %v1158_v21, %v1156_v23 }
 0x11c   :  { %v299_v28 = vadd.f32 %v298_v24, %v297_v18  ;;  %v311_v29 = vrot.slane %v310_v25, 4 }
 0x11d   :  { %v1148_v30 = vadd.f32 %v1147_v26, %v1146_v22  ;;  %v1160_v31 = vrot.slane %v1159_v27, 4  ;;  %1580 = vmatpush3.bf16.msra.mxu0 %v1805_v5  ;;  %v1800_v26 = vld [vmem:[%s2338_s2] sm:$0xff]  }
 0x11e   :  { %v300_v32 = vrot.slane %v299_v28, 2  ;;  %v312_v33 = vadd.f32 %v311_v29, %v310_v25  ;;  %1581 = vmatprep.subr.bf16.mxu0 %v1808_v6  ;;  %v1803_v29 = vld [vmem:[%s2338_s2 + $0x8] sm:$0xff]  }
 0x11f   :  { %v1149_v34 = vrot.slane %v1148_v30, 2  ;;  %v1161_v35 = vadd.f32 %v1160_v31, %v1159_v27  ;;  %v1801_v27 = vld [vmem:[%s2338_s2 + $0x48] sm:$0xff]   ;;  %v1806_v31 = vld [vmem:[%s2338_s2 + $0x10] sm:$0xff]  }
 0x120   :  { %v301_v36 = vadd.f32 %v300_v32, %v299_v28  ;;  %v313_v37 = vrot.slane %v312_v33, 2  ;;  %v1807_v32 = vld [vmem:[%s2338_s2 + $0x58] sm:$0xff]  }
 0x121   :  { %v1150_v38 = vadd.f32 %v1149_v34, %v1148_v30  ;;  %v1162_v39 = vrot.slane %v1161_v35, 2  ;;  %1582 = vmatpush3.bf16.msra.mxu0 %v1808_v6  ;;  %v1804_v30 = vld [vmem:[%s2338_s2 + $0x50] sm:$0xff]   ;;  %v1810_v34 = vld [vmem:[%s2338_s2 + $0x60] sm:$0xff]  }
 0x122   :  { %v302_v41 = vrot.slane %v301_v36, 1  ;;  %v314_v42 = vadd.f32 %v313_v37, %v312_v33  ;;  %v1809_v33 = vld [vmem:[%s2338_s2 + $0x18] sm:$0xff]   ;;  %v1813_v37 = vld [vmem:[%s2338_s2 + $0x68] sm:$0xff]  }
 0x123   :  { %v1151_v44 = vrot.slane %v1150_v38, 1  ;;  %v1163_v45 = vadd.f32 %v1162_v39, %v1161_v35  ;;  %v1811_v35 = vld [vmem:[%s2338_s2 + $0xa0] sm:$0xff]   ;;  %v1815_v39 = vld [vmem:[%s2338_s2 + $0x28] sm:$0xff]  }
 0x124   :  { %v315_v47 = vrot.slane %v314_v42, 1  ;;  %v303_v50 = vadd.f32 %v302_v41, %v301_v36  ;;  %v1812_v36 = vld [vmem:[%s2338_s2 + $0x20] sm:$0xff]   ;;  %1583 = vmatprep.subr.bf16.mxu0 %v1811_v35  ;;  %v1816_v41 = vld [vmem:[%s2338_s2 + $0x70] sm:$0xff]  }
 0x125   :  { %v1164_v48 = vrot.slane %v1163_v45, 1  ;;  %v1152_v53 = vadd.f32 %v1151_v44, %v1150_v38  ;;  %1584 = vmatpush3.bf16.msra.mxu0 %v1811_v35  ;;  %v1814_v38 = vld [vmem:[%s2338_s2 + $0xa8] sm:$0xff]   ;;  %v1818_v44 = vld [vmem:[%s2338_s2 + $0x30] sm:$0xff]  }
 0x126   :  { %v316_v51 = vadd.f32 %v315_v47, %v314_v42  ;;  %1585 = vmatprep.subr.bf16.mxu0 %v1814_v38  ;;  %v1817_v42 = vld [vmem:[%s2338_s2 + $0xb0] sm:$0xff]   ;;  %v1820_v47 = vld [vmem:[%s2338_s2 + $0xb8] sm:$0xff]  }
 0x127   :  { %v1165_v54 = vadd.f32 %v1164_v48, %v1163_v45  ;;  %v1819_v45 = vld [vmem:[%s2338_s2 + $0x78] sm:$0xff]  }
 0x128   :  { %v318_v56 = vsel %vm317_vm3, %v303_v50, %v316_v51  ;;  %v1821_v48 = vld [vmem:[%s2338_s2 + $0x38] sm:$0xff]   ;;  %v481_v50 = vlaneseq }
 0x129   :  { %1568 = vmatmul.mubr.f32.vlgmr.msra.gmra.mrb[0].mxu1 %v318_v56  ;;  %v2087_v57 = vsel %vm317_vm3, %v1152_v53, %v1165_v54  ;;  %1586 = vmatpush3.bf16.msra.mxu0 %v1814_v38 }
 0x12a   :  { %1572 = vmatprep.mubr.msk.f32.mxu1 %vm1829_vm2, %v1830_v59  ;;  %1571 = vmatpush3.msra.mxu1 %v2094_v63  ;;  %v482_v51 = vshrl.u32 %v481_v50, 7 }
 0x12b   :  { %1459 = vmatprep.subr.bf16.mxu1 %v1798_v0  ;;  %1587 = vmatprep.subr.bf16.mxu0 %v1817_v42 }
 0x12c   :  { %v505_v53 = vadd.s32 8, %v482_v51  ;;  %v512_v54 = vand.u32 15, %v482_v51  ;;  %v507_v56 = vadd.s32 24, %v482_v51  ;;  %v2180_v2 = vsub.s32 0, %v482_v51 }
 0x12d   :  { %1588 = vmatpush3.bf16.msra.mxu0 %v1817_v42  ;;  %v2182_v4 = vsub.s32 1, %v482_v51 }
 0x12e   :  { %1589 = vmatprep.subr.bf16.mxu0 %v1820_v47  ;;  %v519_v0 = vand.u32 15, %v505_v53  ;;  %vm2184_vm5 = vcmp.eq.s32.totalorder %v512_v54, 0  ;;  %v533_v6 = vand.u32 15, %v507_v56 }
 0x12f   :  { %vm600_vm7 = vmpackc.low %vm2184_vm5, %vm2184_vm5 }
 0x130   :  { %vm2188_vm6 = vcmp.eq.s32.totalorder %v519_v0, 15  ;;  %vm2199_vm9 = vcmp.eq.s32.totalorder %v533_v6, 15 }
 0x131   :  { %1590 = vmatpush3.bf16.msra.mxu0 %v1820_v47  ;;  %vm631_vm10 = vmpackc.low %vm2188_vm6, %vm2188_vm6 }
 0x132   :  { %1723 = vmatprep.subr.bf16.mxu0 %v1828_v1  ;;  %vm633_vm11 = vmpackc.low %vm2199_vm9, %vm2199_vm9 }
 0x133   :  { %vm2228_vm6 = vmand %vm585_vm14, %vm577_vm13 }
 0x1fc   :  { %v385_v7 = vpop.f32.mrb[0].mxu1 }
 0x1fd   :  { %v389_v8 = vmul.f32 0.001953125, %v385_v7  ;;  %v1569_v10 = vpop.f32.mrb[1].mxu1 }
 0x1ff   :  { %v390_v11 = vmul.f32 %v389_v8, %v389_v8 }
 0x201   :  { %v392_v13 = vrot.slane %v390_v11, 7 }
 0x203   :  { %v394_v14 = vsub.f32 %v389_v8, %v392_v13 }
 0x205   :  { %v395_v16 = vadd.f32 1e-05, %v394_v14 }
 0x207   :  { %1822 = vrsqrt.f32 %v395_v16  ;;  %v506_v16 = vadd.s32 16, %v482_v51 }
 0x211   :  { %v1823_v18 = vpop.eup %1822 }
 0x212   :  { %v398_v21 = vrot.slane %v1823_v18, 1 }
 0x214   :  { %v400_v22 = vmul.f32 %v398_v21, %v2115_v19 }
 0x216   :  { %v401_v23 = vmul.f32 %v400_v22, %v389_v8 }
 0x218   :  { %v403_v24 = vrot.slane %v401_v23, 7 }
 0x21a   :  { %v405_v25 = vsub.f32 %v2115_v19, %v403_v24 }
 0x21c   :  { %v406_v28 = vsel %vm317_vm3, %v400_v22, %v405_v25 }
 0x21d   :  { %1573 = vmatmul.mubr.msk.f32.vlgmr.msra.gmra.mrb[2].mxu1 %vm407_vm4, %v406_v28  ;;  %v1831_v28 = vmov 0  }
 0x21e   :  { %1460 = vmatpush3.bf16.msra.mxu1 %v1800_v26  ;;  %v637_v35 = vsel %vm633_vm11, 65537, %v1831_v28 }
 0x21f   :  { %1461 = vmatprep.subr.bf16.mxu1 %v1801_v27 }
 0x222   :  { %1462 = vmatpush3.bf16.msra.mxu1 %v1803_v29  ;;  %v604_v29 = vsel %vm600_vm7, 65537, %v1831_v28 }
 0x223   :  { %1463 = vmatprep.subr.bf16.mxu1 %v1804_v30  ;;  %v605_v30 = vsel %vm601_vm8, 65537, %v1831_v28 }
 0x224   :  { %v1401_v47 = vcombine.low %v605_v30, %v637_v35 }
 0x226   :  { %1464 = vmatpush3.bf16.msra.mxu1 %v1806_v31  ;;  %v635_v31 = vsel %vm631_vm10, 65537, %v1831_v28  ;;  %vm1439_vm8 = vcmp.eq.s16.totalorder %v1401_v47, 0 }
 0x227   :  { %1465 = vmatprep.subr.bf16.mxu1 %v1807_v32 }
 0x22a   :  { %1466 = vmatpush3.bf16.msra.mxu1 %v1809_v33 }
 0x22b   :  { %1467 = vmatprep.subr.bf16.mxu1 %v1810_v34 }
 0x22e   :  { %1468 = vmatpush3.bf16.msra.mxu1 %v1812_v36  ;;  %v1398_v36 = vcombine.low %v604_v29, %v605_v30 }
 0x22f   :  { %1469 = vmatprep.subr.bf16.mxu1 %v1813_v37  ;;  %v1400_v37 = vcombine.low %v605_v30, %v635_v31 }
 0x230   :  { %vm1436_vm5 = vcmp.eq.s16.totalorder %v1398_v36, 0 }
 0x231   :  { %vm1438_vm7 = vcmp.eq.s16.totalorder %v1400_v37, 0 }
 0x232   :  { %1470 = vmatpush3.bf16.msra.mxu1 %v1815_v39 }
 0x233   :  { %1471 = vmatprep.subr.bf16.mxu1 %v1816_v41 }
 0x236   :  { %1472 = vmatpush3.bf16.msra.mxu1 %v1818_v44 }
 0x237   :  { %1473 = vmatprep.subr.bf16.mxu1 %v1819_v45 }
 0x23a   :  { %1474 = vmatpush3.bf16.msra.mxu1 %v1821_v48 }
 0x23b   :  { %1699 = vmatprep.subr.bf16.mxu1 %v1828_v1 }
 0x2f0   :  { %v477_v7 = vpop.f32.mrb[2].mxu1 }
 0x2f1   :  { %v484_v10 = vrot.slane %v477_v7, %v2180_v2  ;;  %v1574_v11 = vpop.f32.mrb[3].mxu1  ;;  %v492_v13 = vrot.slane %v477_v7, %v2182_v4 }
 0x2f3   :  { %v487_v18 = vmul.f32 %v484_v10, %v2065_v9  ;;  %v488_v21 = vmul.f32 %v484_v10, %v2075_v15  ;;  %v485_v22 = vmul.f32 %v484_v10, %v2045_v60  ;;  %v486_v23 = vmul.f32 %v484_v10, %v2049_v62 }
 0x2f4   :  { %v526_v9 = vand.u32 15, %v506_v16 }
 0x2f5   :  { %v495_v24 = vadd.f32 %v492_v13, %v487_v18  ;;  %v496_v25 = vadd.f32 %v492_v13, %v488_v21  ;;  %v493_v26 = vadd.f32 %v492_v13, %v485_v22  ;;  %v494_v27 = vadd.f32 %v492_v13, %v486_v23 }
 0x2f6   :  { %vm2213_vm15 = vcmp.eq.s32.totalorder %v526_v9, 0 }
 0x2f7   :  { %v499_v60 = vmax.f32 %v495_v24, 0.0  ;;  %v500_v15 = vmax.f32 %v496_v25, 0.0  ;;  %v497_v62 = vmax.f32 %v493_v26, 0.0  ;;  %v498_v32 = vmax.f32 %v494_v27, 0.0  ;;  %vm602_vm1 = vmpackc.low %vm2213_vm15, %vm2213_vm15 }
 0x2f8   :  { %v606_v7 = vsel %vm602_vm1, 65537, %v1831_v28 }
 0x2f9   :  { %v502_v33 = vpack.c.bf16 %v500_v15, %v499_v60  ;;  %v501_v34 = vpack.c.bf16 %v498_v32, %v497_v62  ;;  %v1399_v14 = vcombine.low %v606_v7, %v605_v30 }
 0x2fb   :  { %v558_v39 = vshrl.u32 %v501_v34, 16  ;;  %v561_v41 = vshll.u32 %v501_v34, 16  ;;  %872 = vmatprep.mubr.bf16.mxu1 %v501_v34  ;;  %v565_v42 = vshrl.u32 %v502_v33, 16  ;;  %v568_v44 = vshll.u32 %v502_v33, 16 }
 0x2fc   :  { %vm1437_vm9 = vcmp.eq.s16.totalorder %v1399_v14, 0 }
 0x2fd   :  { %v560_v48 = vrot.slane %v558_v39, 7  ;;  %v578_v50 = vrot.slane %v561_v41, 1  ;;  %v580_v51 = vrot.slane %v568_v44, 1  ;;  %v567_v53 = vrot.slane %v565_v42, 7 }
 0x2ff   :  { %v563_v56 = vor.u32 %v561_v41, %v560_v48  ;;  %v579_v0 = vor.u32 %v578_v50, %v558_v39  ;;  %v582_v5 = vor.u32 %v580_v51, %v565_v42  ;;  %v570_v6 = vor.u32 %v568_v44, %v567_v53 }
 0x301   :  { %v576_v8 = vsel %vm2219_vm0, 0, %v563_v56  ;;  %v581_v10 = vsel %vm577_vm13, %v579_v0, %v580_v51  ;;  %v587_v11 = vsel %vm2228_vm6, %v582_v5, 0  ;;  %v571_v13 = vsel %vm556_vm12, %v560_v48, %v570_v6 }
 0x302   :  { %1427 = vmatmul.mubr.msk.bf16.vlgmr.msra.gmra.mrb[4].mxu1 %vm1436_vm5, %v576_v8  ;;  %1591 = vmatprep.mubr.msk.bf16.mxu0 %vm1438_vm7, %v581_v10 }
 0x303   :  { %880 = vmatprep.mubr.bf16.mxu1 %v502_v33  ;;  %1592 = vmatmul.mubr.msk.bf16.vlgmr.msra.gmra.mrb[8].mxu0 %vm1439_vm8, %v587_v11 }
 0x304   :  { %1725 = vmatpush3.bf16.msra.mxu0 %v1917_v17  ;;  %1667 = vmatprep.mubr.msk.f32.mxu0 %vm1829_vm2, %v1830_v59 }
 0x305   :  { %1726 = vmatprep.subr.bf16.mxu0 %v1828_v1  ;;  %1701 = vmatpush3.bf16.msra.mxu1 %v1917_v17 }
 0x306   :  { %1702 = vmatprep.subr.bf16.mxu1 %v1828_v1 }
 0x308   :  { %1728 = vmatpush3.bf16.msra.mxu0 %v1979_v40 }
 0x309   :  { %1729 = vmatprep.subr.bf16.mxu0 %v1828_v1  ;;  %1704 = vmatpush3.bf16.msra.mxu1 %v1979_v40 }
 0x30a   :  { %1429 = vmatmul.mubr.msk.bf16.gmra.mrb[8].mxu1 %vm1437_vm9, %v571_v13  ;;  %1705 = vmatprep.subr.bf16.mxu1 %v1828_v1 }
 0x30b   :  { %1627 = vmatprep.mubr.msk.f32.mxu1 %vm1829_vm2, %v1830_v59 }
 0x30c   :  { %1731 = vmatpush3.bf16.msra.mxu0 %v1989_v43 }
 0x30d   :  { %1732 = vmatprep.subr.bf16.mxu0 %v1828_v1  ;;  %1707 = vmatpush3.bf16.msra.mxu1 %v1989_v43 }
 0x30e   :  { %1708 = vmatprep.subr.bf16.mxu1 %v1828_v1 }
 0x310   :  { %1734 = vmatpush3.bf16.msra.mxu0 %v1999_v46 }
 0x311   :  { %1735 = vmatprep.subr.bf16.mxu0 %v1828_v1  ;;  %1710 = vmatpush3.bf16.msra.mxu1 %v1999_v46 }
 0x312   :  { %1711 = vmatprep.subr.bf16.mxu1 %v1828_v1 }
 0x314   :  { %1737 = vmatpush3.bf16.msra.mxu0 %v2009_v49 }
 0x315   :  { %1738 = vmatprep.subr.bf16.mxu0 %v1828_v1  ;;  %1713 = vmatpush3.bf16.msra.mxu1 %v2009_v49 }
 0x316   :  { %1714 = vmatprep.subr.bf16.mxu1 %v1828_v1 }
 0x318   :  { %1740 = vmatpush3.bf16.msra.mxu0 %v2019_v52 }
 0x319   :  { %1741 = vmatprep.subr.bf16.mxu0 %v1828_v1  ;;  %1716 = vmatpush3.bf16.msra.mxu1 %v2019_v52 }
 0x31a   :  { %1717 = vmatprep.subr.bf16.mxu1 %v1828_v1 }
 0x31c   :  { %1743 = vmatpush3.bf16.msra.mxu0 %v2029_v55 }
 0x31d   :  { %1744 = vmatprep.subr.bf16.mxu0 %v1828_v1  ;;  %1719 = vmatpush3.bf16.msra.mxu1 %v2029_v55 }
 0x31e   :  { %1720 = vmatprep.subr.bf16.mxu1 %v1828_v1 }
 0x320   :  { %1746 = vmatpush3.bf16.msra.mxu0 %v2039_v58 }
 0x321   :  { %1722 = vmatpush3.bf16.msra.mxu1 %v2039_v58 }
 0x322   :  { %1630 = vmatprep.subr.mxu1 %v1830_v59 }
 0x323   :  { %1668 = vmatmul.mubr.f32.vlgmr.msra.gmra.mrb[12].mxu0 %v2087_v57 }
 0x3d5   :  { %v1475_v17 = vpop.f32.mrb[4].mxu1 }
 0x3d6   :  { %v1476_v40 = vpop.f32.mrb[5].mxu1  ;;  %v1593_v43 = vpop.f32.mrb[8].mxu0 }
 0x3d7   :  { %v1477_v46 = vadd.f32 %v1476_v40, %v1475_v17  ;;  %v1478_v49 = vpop.f32.mrb[6].mxu1  ;;  %v923_v52 = vpop.f32.mrb[9].mxu0 }
 0x3d8   :  { %v1479_v16 = vpop.f32.mrb[7].mxu1  ;;  %v1594_v18 = vpop.f32.mrb[10].mxu0 }
 0x3d9   :  { %v2274_v21 = vadd.f32 %v1477_v46, %v923_v52  ;;  %v1480_v55 = vadd.f32 %v1479_v16, %v1478_v49  ;;  %v926_v1 = vpop.f32.mrb[11].mxu0 }
 0x3db   :  { %v2276_v22 = vadd.f32 %v1480_v55, %v926_v1  ;;  %v947_v27 = vmul.f32 %v2274_v21, %v2274_v21 }
 0x3dd   :  { %v1481_v23 = vpop.f32.mrb[8].mxu1  ;;  %v948_v24 = vmul.f32 %v2276_v22, %v2276_v22  ;;  %v938_v28 = vadd.f32 %v2276_v22, %v2274_v21 }
 0x3de   :  { %v1482_v58 = vpop.f32.mrb[9].mxu1 }
 0x3df   :  { %v1483_v57 = vadd.f32 %v1482_v58, %v1481_v23  ;;  %v1484_v25 = vpop.f32.mrb[10].mxu1  ;;  %v951_v31 = vadd.f32 %v948_v24, %v947_v27 }
 0x3e0   :  { %v1485_v26 = vpop.f32.mrb[11].mxu1 }
 0x3e1   :  { %v2284_v29 = vadd.f32 %v1593_v43, %v1483_v57  ;;  %v1486_v30 = vadd.f32 %v1485_v26, %v1484_v25 }
 0x3e3   :  { %v939_v9 = vadd.f32 %v938_v28, %v2284_v29  ;;  %v949_v60 = vmul.f32 %v2284_v29, %v2284_v29  ;;  %v2289_v15 = vadd.f32 %v1594_v18, %v1486_v30 }
 0x3e5   :  { %v952_v62 = vadd.f32 %v951_v31, %v949_v60  ;;  %v940_v32 = vadd.f32 %v939_v9, %v2289_v15  ;;  %v950_v33 = vmul.f32 %v2289_v15, %v2289_v15 }
 0x3e7   :  { %v941_v34 = vrot.slane %v940_v32, 4  ;;  %v953_v35 = vadd.f32 %v952_v62, %v950_v33 }
 0x3e9   :  { %v942_v36 = vadd.f32 %v941_v34, %v940_v32  ;;  %v954_v37 = vrot.slane %v953_v35, 4 }
 0x3eb   :  { %v943_v38 = vrot.slane %v942_v36, 2  ;;  %v955_v39 = vadd.f32 %v954_v37, %v953_v35 }
 0x3ed   :  { %v944_v41 = vadd.f32 %v943_v38, %v942_v36  ;;  %v956_v42 = vrot.slane %v955_v39, 2 }
 0x3ef   :  { %v945_v44 = vrot.slane %v944_v41, 1  ;;  %v957_v45 = vadd.f32 %v956_v42, %v955_v39 }
 0x3f1   :  { %v958_v47 = vrot.slane %v957_v45, 1  ;;  %v946_v48 = vadd.f32 %v945_v44, %v944_v41 }
 0x3f3   :  { %v959_v50 = vadd.f32 %v958_v47, %v957_v45 }
 0x3f5   :  { %v960_v51 = vsel %vm317_vm3, %v946_v48, %v959_v50 }
 0x3f6   :  { %v1233_v53 = vpop.f32.mrb[12].mxu0  ;;  %1628 = vmatmul.mubr.f32.vlgmr.msra.gmra.mrb[12].mxu1 %v960_v51 }
 0x3f7   :  { %v1669_v54 = vpop.f32.mrb[13].mxu0  ;;  %1631 = vmatpush3.msra.mxu1 %v2094_v63  ;;  %1632 = vmatprep.mubr.msk.f32.mxu1 %vm1829_vm2, %v1830_v59  ;;  %v1237_v56 = vmul.f32 0.001953125, %v1233_v53 }
 0x3f8   :  { %1670 = vmatprep.subr.mxu1 %v1830_v59 }
 0x3f9   :  { %v1238_v0 = vmul.f32 %v1237_v56, %v1237_v56 }
 0x3fb   :  { %v1240_v5 = vrot.slane %v1238_v0, 7 }
 0x3fd   :  { %v1242_v6 = vsub.f32 %v1237_v56, %v1240_v5 }
 0x3ff   :  { %v1243_v7 = vadd.f32 1e-05, %v1242_v6 }
 0x401   :  { %1824 = vrsqrt.f32 %v1243_v7 }
 0x40b   :  { %v1825_v40 = vpop.eup %1824 }
 0x40c   :  { %v1246_v46 = vrot.slane %v1825_v40, 5 }
 0x40e   :  { %v1248_v49 = vmul.f32 %v1246_v46, %v2115_v19 }
 0x410   :  { %v1250_v52 = vrot.slane %v1248_v49, 4 }
 0x412   :  { %v1252_v55 = vmul.f32 %v1250_v52, %v1237_v56 }
 0x414   :  { %v1254_v58 = vrot.slane %v1252_v55, 3 }
 0x416   :  { %v1256_v25 = vsub.f32 %v2115_v19, %v1254_v58 }
 0x418   :  { %v1258_v28 = vrot.slane %v1256_v25, 4 }
 0x41a   :  { %v1260_v31 = vsel %vm317_vm3, %v1250_v52, %v1258_v28 }
 0x4c9   :  { %v1027_v8 = vpop.f32.mrb[12].mxu1 }
 0x4ca   :  { %v1031_v10 = vmul.f32 0.001953125, %v1027_v8  ;;  %v1629_v11 = vpop.f32.mrb[13].mxu1 }
 0x4cc   :  { %v1032_v13 = vmul.f32 %v1031_v10, %v1031_v10 }
 0x4ce   :  { %v1034_v14 = vrot.slane %v1032_v13, 7 }
 0x4d0   :  { %v1036_v17 = vsub.f32 %v1031_v10, %v1034_v14 }
 0x4d2   :  { %v1037_v43 = vadd.f32 1e-05, %v1036_v17 }
 0x4d4   :  { %1826 = vrsqrt.f32 %v1037_v43 }
 0x4de   :  { %v1827_v16 = vpop.eup %1826 }
 0x4df   :  { %v1040_v18 = vrot.slane %v1827_v16, 7 }
 0x4e1   :  { %v1042_v1 = vmul.f32 %v1040_v18, %v2115_v19 }
 0x4e3   :  { %v1044_v23 = vrot.slane %v1042_v1, 2 }
 0x4e5   :  { %v1046_v24 = vmul.f32 %v1044_v23, %v1031_v10 }
 0x4e7   :  { %v1048_v57 = vrot.slane %v1046_v24, 5 }
 0x4e9   :  { %v1050_v26 = vsub.f32 %v2115_v19, %v1048_v57 }
 0x4eb   :  { %v1052_v27 = vrot.slane %v1050_v26, 2 }
 0x4ed   :  { %v1054_v30 = vsel %vm317_vm3, %v1044_v23, %v1052_v27 }
 0x4ee   :  { %1633 = vmatmul.mubr.msk.f32.vlgmr.msra.gmra.mrb[14].mxu1 %vm407_vm4, %v1054_v30 }
 0x4ef   :  { %1671 = vmatpush3.msra.mxu1 %v2094_v63  ;;  %1672 = vmatprep.mubr.msk.f32.mxu1 %vm1829_vm2, %v1830_v59 }
 0x4f2   :  { %1673 = vmatmul.mubr.msk.f32.vlgmr.msra.gmra.mrb[16].mxu1 %vm407_vm4, %v1260_v31 }
 0x5c1   :  { %v1124_v9 = vpop.f32.mrb[14].mxu1 }
 0x5c2   :  { %v1131_v60 = vrot.slane %v1124_v9, %v2180_v2  ;;  %v1634_v62 = vpop.f32.mrb[15].mxu1  ;;  %v1139_v36 = vrot.slane %v1124_v9, %v2182_v4 }
 0x5c4   :  { %v1132_v32 = vmul.f32 %v1131_v60, %v2274_v21  ;;  %v1133_v33 = vmul.f32 %v1131_v60, %v2276_v22  ;;  %v1134_v34 = vmul.f32 %v1131_v60, %v2284_v29  ;;  %v1135_v63 = vmul.f32 %v1131_v60, %v2289_v15 }
 0x5c5   :  { %v1330_v19 = vpop.f32.mrb[16].mxu1 }
 0x5c6   :  { %v1674_v35 = vpop.f32.mrb[17].mxu1  ;;  %v1337_v59 = vrot.slane %v1330_v19, %v2180_v2  ;;  %v1345_v37 = vrot.slane %v1330_v19, %v2182_v4  ;;  %v1140_v22 = vadd.f32 %v1139_v36, %v1132_v32  ;;  %v1141_v42 = vadd.f32 %v1139_v36, %v1133_v33 }
 0x5c7   :  { %v1142_v29 = vadd.f32 %v1139_v36, %v1134_v34  ;;  %v1143_v44 = vadd.f32 %v1139_v36, %v1135_v63 }
 0x5c8   :  { %v1338_v38 = vmul.f32 %v1337_v59, %v2047_v61  ;;  %v1339_v39 = vmul.f32 %v1337_v59, %v2057_v3  ;;  %v1340_v41 = vmul.f32 %v1337_v59, %v2070_v12  ;;  %v1341_v21 = vmul.f32 %v1337_v59, %v2080_v20 }
 0x5ca   :  { %v1346_v15 = vadd.f32 %v1345_v37, %v1338_v38  ;;  %v1347_v45 = vadd.f32 %v1345_v37, %v1339_v39  ;;  %v1348_v47 = vadd.f32 %v1345_v37, %v1340_v41  ;;  %v1349_v2 = vadd.f32 %v1345_v37, %v1341_v21 }
 0x5cc   :  { %v1350_v48 = vadd.f32 %v1346_v15, %v1140_v22  ;;  %v1351_v50 = vadd.f32 %v1347_v45, %v1141_v42  ;;  %v1352_v51 = vadd.f32 %v1348_v47, %v1142_v29  ;;  %v1353_v4 = vadd.f32 %v1349_v2, %v1143_v44 }
 0x5ce   :  { %1354 = vst [vmem:[%s2340_s6] sm:$0xff] %v1350_v48  ;;  %1355 = vst [vmem:[%s2340_s6 + $0x8] sm:$0xff] %v1351_v50 }
 0x5cf   :  { %1356 = vst [vmem:[%s2340_s6 + $0x10] sm:$0xff] %v1352_v51  ;;  %1357 = vst [vmem:[%s2340_s6 + $0x18] sm:$0xff] %v1353_v4 }

</bundles_post_ra>
